<compile_context>
chip_gen: v7x
topology: tpu7x:2x2x1
jax: 0.10.0
libtpu: 0.0.40
codegen_flags: <defaults>
</compile_context>

<pallas_src>
import functools
import math

import jax
import jax.numpy as jnp
from jax.experimental import pallas as pl
from jax.experimental.pallas import tpu as pltpu


# ---------------------------------------------------------------------------
# Generation-aware limits
# ---------------------------------------------------------------------------
def _tpu_vmem_capacity_bytes():
    try:
        return int(pltpu.get_tpu_info().vmem_capacity_bytes)
    except Exception:
        return 64 * 1024 * 1024  # conservative fallback (v7x per-core VMEM)


_VMEM_CAP = _tpu_vmem_capacity_bytes()
# ~40 MiB on v7x (64 MiB VMEM), ~80 MiB on v5e/v6e (128 MiB): headroom for compiler
# scratch on v7x without capping tile sizes on the big-VMEM generations.
_VMEM_LIMIT = int(_VMEM_CAP * 5 // 8)
# Projection-GEMM row tile: bigger on v5e/v6e, smaller on v7x.
_LINEAR_TM = 1024 if _VMEM_CAP >= 96 * 1024 * 1024 else 512


def _itemsize(dtype):
    return 2 if dtype in (jnp.bfloat16, jnp.float16) else 4


# ---------------------------------------------------------------------------
# Kernels
# ---------------------------------------------------------------------------
def _linear_kernel(x_ref, w_ref, b_ref, o_ref):
    """o = x @ w + b.  x:(TM,Din) f32 is cast to the (resident) weight dtype
    in-kernel so the f32 activation is read from HBM exactly once."""
    x = x_ref[...].astype(w_ref.dtype)
    acc = jnp.dot(x, w_ref[...], preferred_element_type=jnp.float32)
    o_ref[...] = (acc + b_ref[...]).astype(o_ref.dtype)


def _fused_attn_kernel(x_ref, kv_ref, mask_ref, wq_ref, bq_ref, wo_ref, bo_ref,
                       g_ref, bt_ref, o_ref, q_scr, attn_scr, *,
                       num_heads, head_dim, scale, compute_dtype):
    """Per-(batch, Lq-tile) fused: Q-proj -> MHA -> out-proj -> residual -> LN.

    x_ref:(TQ,D) f32   kv_ref:(Lk,2D) compute-dtype   mask_ref:(1,Lk) f32
    wq/wo:(D,D) compute-dtype   bq/bo/g/bt:(1,D) f32   o_ref:(TQ,D)
    q_scr / attn_scr:(TQ,D) f32 VMEM scratch.
    """
    H, hd = num_heads, head_dim
    D = H * hd

    x = x_ref[...].astype(jnp.float32)                      # residual, f32

    # Fused Q projection: rides on the MXU slack of the attention kernel and
    # removes a full HBM write+read of (B, Lq, D) plus a kernel launch.
    q = jnp.dot(x.astype(compute_dtype), wq_ref[...],
                preferred_element_type=jnp.float32) + bq_ref[...]
    q_scr[...] = q

    # key-padding additive bias: 0 for valid keys, -1e9 for padded ones.
    bias = (mask_ref[...].astype(jnp.float32) - 1.0) * 1e9   # (1, Lk)

    # TODO(synk): for very long Lk also tile the key axis with an online-softmax
    # accumulator (only needed once (Lk, 2D) no longer fits VMEM).
    for h in range(H):                                       # static unroll
        # Static ref slices -> only the needed columns reach vregs.
        qh = q_scr[:, h * hd:(h + 1) * hd].astype(compute_dtype)   # (TQ, hd)
        kh = kv_ref[:, h * hd:(h + 1) * hd]                        # (Lk, hd)
        vh = kv_ref[:, D + h * hd:D + (h + 1) * hd]                # (Lk, hd)

        # QK^T via dot_general contracting last dims (no explicit .T / XLU work).
        s = jax.lax.dot_general(qh, kh, (((1,), (1,)), ((), ())),
                                preferred_element_type=jnp.float32)
        s = s * scale + bias                                       # (TQ, Lk)
        m = jnp.max(s, axis=-1, keepdims=True)
        p = jnp.exp(s - m)                                         # unnormalised
        # Deferred normalisation: scale the (TQ, hd) PV result instead of the
        # (TQ, Lk) probabilities; reciprocal goes to the EUP slot.
        inv = pl.reciprocal(jnp.sum(p, axis=-1, keepdims=True), approx=True)
        o_h = jnp.dot(p.astype(compute_dtype), vh,
                      preferred_element_type=jnp.float32) * inv
        attn_scr[:, h * hd:(h + 1) * hd] = o_h                     # no concat

    y = jnp.dot(attn_scr[...].astype(compute_dtype), wo_ref[...],
                preferred_element_type=jnp.float32) + bo_ref[...]
    z = x + y                                                      # residual
    mu = jnp.mean(z, axis=-1, keepdims=True)
    var = jnp.mean((z - mu) * (z - mu), axis=-1, keepdims=True)
    zn = (z - mu) * jax.lax.rsqrt(var + 1e-5)
    o_ref[...] = (zn * g_ref[...] + bt_ref[...]).astype(o_ref.dtype)


# ---------------------------------------------------------------------------
# Wrappers
# ---------------------------------------------------------------------------
def _linear(x, w, b, *, out_dtype, tm=_LINEAR_TM):
    """Row-tiled, software-pipelined GEMM: (M,Din) @ (Din,Dout) + (1,Dout)."""
    M, Din = x.shape
    Dout = w.shape[1]
    tm = min(tm, M)
    grid = (pl.cdiv(M, tm),)
    bytes_accessed = (4 * M * Din + _itemsize(w.dtype) * Din * Dout + 4 * Dout
                      + _itemsize(out_dtype) * M * Dout)
    return pl.pallas_call(
        _linear_kernel,
        out_shape=jax.ShapeDtypeStruct((M, Dout), out_dtype),
        grid=grid,
        in_specs=[
            pl.BlockSpec((tm, Din), lambda i: (i, 0)),
            pl.BlockSpec((Din, Dout), lambda i: (0, 0)),   # weight stays resident
            pl.BlockSpec((1, Dout), lambda i: (0, 0)),
        ],
        out_specs=pl.BlockSpec((tm, Dout), lambda i: (i, 0)),
        compiler_params=pltpu.CompilerParams(
            dimension_semantics=("parallel",),
            vmem_limit_bytes=_VMEM_LIMIT),
        cost_estimate=pl.CostEstimate(
            flops=2 * M * Din * Dout,
            transcendentals=0,
            bytes_accessed=bytes_accessed),
    )(x, w, b)


def dense_to_sparse_distillation(sparse_feat, dense_feat, dense_mask, params,
                                 num_heads, *, compute_dtype=jnp.bfloat16):
    B, Lq, D = sparse_feat.shape
    _, Lk, _ = dense_feat.shape
    H = num_heads
    assert D % H == 0
    hd = D // H
    scale = 1.0 / math.sqrt(hd)
    cdt = compute_dtype

    # --- Fused K+V projection: single (D, 2D) GEMM; dense_feat read once; the
    # kv intermediate is emitted in the compute dtype (bf16 halves HBM traffic).
    wkv = jnp.concatenate([params["wk"], params["wv"]], axis=1).astype(cdt)
    bkv = jnp.concatenate([params["bk"], params["bv"]], axis=1).astype(jnp.float32)
    kv = _linear(dense_feat.reshape(B * Lk, D), wkv, bkv,
                 out_dtype=cdt).reshape(B, Lk, 2 * D)

    if dense_mask is None:
        dense_mask = jnp.ones((B, Lk), jnp.float32)
    mask3 = dense_mask.astype(jnp.float32).reshape(B, 1, Lk)

    # --- Fused Q-proj + attention + out-proj + residual + LayerNorm.
    # Grid over (batch, Lq tiles): kv / weights stay resident across the inner
    # Lq axis; the tiled axis bounds VMEM and feeds v7x's two TensorCores.
    tq = Lq if Lq <= 128 else 128
    nq = pl.cdiv(Lq, tq)

    attn_flops = 4 * B * Lq * D * D + 4 * B * Lq * Lk * D
    attn_bytes = (8 * B * Lq * D + _itemsize(cdt) * B * Lk * 2 * D + 4 * B * Lk
                  + 2 * _itemsize(cdt) * D * D + 16 * D)

    kernel = functools.partial(_fused_attn_kernel, num_heads=H, head_dim=hd,
                               scale=scale, compute_dtype=cdt)
    out = pl.pallas_call(
        kernel,
        out_shape=jax.ShapeDtypeStruct((B, Lq, D), sparse_feat.dtype),
        grid=(B, nq),
        in_specs=[
            pl.BlockSpec((None, tq, D), lambda b, i: (b, i, 0)),      # sparse tile
            pl.BlockSpec((None, Lk, 2 * D), lambda b, i: (b, 0, 0)),  # kv / batch
            pl.BlockSpec((None, 1, Lk), lambda b, i: (b, 0, 0)),      # mask
            pl.BlockSpec((D, D), lambda b, i: (0, 0)),                # wq (resident)
            pl.BlockSpec((1, D), lambda b, i: (0, 0)),                # bq
            pl.BlockSpec((D, D), lambda b, i: (0, 0)),                # wo (resident)
            pl.BlockSpec((1, D), lambda b, i: (0, 0)),                # bo
            pl.BlockSpec((1, D), lambda b, i: (0, 0)),                # gamma
            pl.BlockSpec((1, D), lambda b, i: (0, 0)),                # beta
        ],
        out_specs=pl.BlockSpec((None, tq, D), lambda b, i: (b, i, 0)),
        scratch_shapes=[pltpu.VMEM((tq, D), jnp.float32),   # q tile
                        pltpu.VMEM((tq, D), jnp.float32)],  # per-head attn out
        compiler_params=pltpu.CompilerParams(
            dimension_semantics=("parallel", "parallel"),
            vmem_limit_bytes=_VMEM_LIMIT),
        cost_estimate=pl.CostEstimate(
            flops=attn_flops,
            transcendentals=B * H * Lq * Lk,
            bytes_accessed=attn_bytes),
    )(sparse_feat, kv, mask3,
      params["wq"].astype(cdt), params["bq"].astype(jnp.float32),
      params["wo"].astype(cdt), params["bo"].astype(jnp.float32),
      params["gamma"].astype(jnp.float32), params["beta"].astype(jnp.float32))
    return out


# ---------------------------------------------------------------------------
# Pure-JAX reference (for correctness check)
# ---------------------------------------------------------------------------
def reference(sparse_feat, dense_feat, dense_mask, p, num_heads):
    B, Lq, D = sparse_feat.shape
    _, Lk, _ = dense_feat.shape
    H, hd = num_heads, D // num_heads
    scale = 1.0 / math.sqrt(hd)

    q = sparse_feat @ p["wq"] + p["bq"]
    k = dense_feat @ p["wk"] + p["bk"]
    v = dense_feat @ p["wv"] + p["bv"]
    q4 = q.reshape(B, Lq, H, hd).transpose(0, 2, 1, 3)
    k4 = k.reshape(B, Lk, H, hd).transpose(0, 2, 1, 3)
    v4 = v.reshape(B, Lk, H, hd).transpose(0, 2, 1, 3)
    bias = ((1.0 - dense_mask) * (-1e9))[:, None, None, :]
    s = jnp.einsum("bhqd,bhkd->bhqk", q4, k4) * scale + bias
    a = jax.nn.softmax(s, axis=-1)
    o = jnp.einsum("bhqk,bhkd->bhqd", a, v4)
    o = o.transpose(0, 2, 1, 3).reshape(B, Lq, D)
    y = o @ p["wo"] + p["bo"]
    z = sparse_feat + y
    mu = jnp.mean(z, axis=-1, keepdims=True)
    var = jnp.mean((z - mu) ** 2, axis=-1, keepdims=True)
    return (z - mu) / jnp.sqrt(var + 1e-5) * p["gamma"] + p["beta"]


# ---------------------------------------------------------------------------
if __name__ == "__main__":
    # Small, self-consistent shapes: hidden_dim=32, num_heads=4.
    B, Lq, Lk, D, H = 2, 8, 16, 32, 4

    key = jax.random.PRNGKey(0)
    ks = jax.random.split(key, 8)

    def init_w(k):
        return jax.random.normal(k, (D, D), jnp.float32) * 0.02

    params = {
        "wq": init_w(ks[0]), "bq": jnp.zeros((1, D), jnp.float32),
        "wk": init_w(ks[1]), "bk": jnp.zeros((1, D), jnp.float32),
        "wv": init_w(ks[2]), "bv": jnp.zeros((1, D), jnp.float32),
        "wo": init_w(ks[3]), "bo": jnp.zeros((1, D), jnp.float32),
        "gamma": jnp.ones((1, D), jnp.float32),
        "beta": jnp.zeros((1, D), jnp.float32),
    }

    sparse_feat = jax.random.normal(ks[4], (B, Lq, D), jnp.float32)
    dense_feat = jax.random.normal(ks[5], (B, Lk, D), jnp.float32)
    # dense_mask: 1 = valid, 0 = padded (key_padding_mask = ~mask)
    dense_mask = jnp.ones((B, Lk), jnp.float32).at[1, Lk // 2:].set(0.0)

    ref = reference(sparse_feat, dense_feat, dense_mask, params, num_heads=H)

    # f32 path: strict numerical check against the pure-JAX reference.
    out_f32 = dense_to_sparse_distillation(sparse_feat, dense_feat, dense_mask,
                                           params, num_heads=H,
                                           compute_dtype=jnp.float32)
    out_f32 = jax.block_until_ready(out_f32)
    assert out_f32.shape == (B, Lq, D)
    assert jnp.allclose(out_f32, ref, atol=5e-4, rtol=5e-4), (
        f"f32 path max diff {jnp.max(jnp.abs(out_f32 - ref))}")

    # bf16 fast path (production default: bf16 MXU operands, f32 accumulation).
    out_bf16 = dense_to_sparse_distillation(sparse_feat, dense_feat, dense_mask,
                                            params, num_heads=H,
                                            compute_dtype=jnp.bfloat16)
    out_bf16 = jax.block_until_ready(out_bf16)
    assert out_bf16.shape == (B, Lq, D)
    assert jnp.allclose(out_bf16, ref, atol=2e-2, rtol=2e-2), (
        f"bf16 path max diff {jnp.max(jnp.abs(out_bf16 - ref))}")

    # TODO(synk): dropout (attn_drop / proj_drop / outer Dropout) is identity here
    # (inference semantics); stochastic training-mode dropout is not implemented.
    print("KERNEL_OK")
</pallas_src>

<mosaic_0001>
module attributes {stable_mosaic.version = 11 : i64} {
  func.func @_linear_kernel(%arg0: i32, %arg1: memref<32x32xf32, #tpu.memory_space<vmem>>, %arg2: memref<32x64xf32, #tpu.memory_space<vmem>>, %arg3: memref<1x64xf32, #tpu.memory_space<vmem>>, %arg4: memref<32x64xf32, #tpu.memory_space<vmem>>) attributes {dimension_semantics = [#tpu.dimension_semantics<parallel>], iteration_bounds = array<i64: 1>, scalar_prefetch = 0 : i64, scratch_operands = 0 : i64, tpu.core_type = #tpu.core_type<tc>, window_params = [{transform_indices = @transform_0, window_bounds = array<i64: 32, 32>}, {pipeline_mode = #tpu.pipeline_mode<synchronous>, transform_indices = @transform_1, window_bounds = array<i64: 32, 64>}, {pipeline_mode = #tpu.pipeline_mode<synchronous>, transform_indices = @transform_2, window_bounds = array<i64: 1, 64>}, {transform_indices = @transform_3, window_bounds = array<i64: 32, 64>}]} {
    %c0 = arith.constant 0 : index
    %c0_0 = arith.constant 0 : index
    %0 = vector.load %arg1[%c0, %c0_0] : memref<32x32xf32, #tpu.memory_space<vmem>>, vector<32x32xf32>
    %c0_1 = arith.constant 0 : index
    %c0_2 = arith.constant 0 : index
    %1 = vector.load %arg2[%c0_1, %c0_2] : memref<32x64xf32, #tpu.memory_space<vmem>>, vector<32x64xf32>
    %cst = arith.constant dense<0.000000e+00> : vector<32x64xf32>
    %2 = tpu.matmul %0, %1, %cst {dimension_numbers = #tpu.dot_dimension_numbers<[1], [0], [0], [1], [0, 0, 1, 1], [], []>} : vector<32x32xf32>, vector<32x64xf32>, vector<32x64xf32> -> vector<32x64xf32>
    %c0_3 = arith.constant 0 : index
    %c0_4 = arith.constant 0 : index
    %3 = vector.load %arg3[%c0_3, %c0_4] : memref<1x64xf32, #tpu.memory_space<vmem>>, vector<1x64xf32>
    %4 = vector.broadcast %3 : vector<1x64xf32> to vector<32x64xf32>
    %5 = arith.addf %2, %4 : vector<32x64xf32>
    %c0_5 = arith.constant 0 : index
    %c0_6 = arith.constant 0 : index
    %6 = vector.load %arg4[%c0_5, %c0_6] : memref<32x64xf32, #tpu.memory_space<vmem>>, vector<32x64xf32>
    tpu.vector_store %arg4[%c0_5, %c0_6], %5 {strides = array<i32>} : memref<32x64xf32, #tpu.memory_space<vmem>>, vector<32x64xf32>,
    return
  }
  func.func @transform_0(%arg0: i32) -> (i32, i32) {
    %c0_i32 = arith.constant 0 : i32
    %c0_i32_0 = arith.constant 0 : i32
    return %arg0, %c0_i32 : i32, i32
  }
  func.func @transform_1(%arg0: i32) -> (i32, i32) {
    %c0_i32 = arith.constant 0 : i32
    %c0_i32_0 = arith.constant 0 : i32
    %c0_i32_1 = arith.constant 0 : i32
    return %c0_i32, %c0_i32_0 : i32, i32
  }
  func.func @transform_2(%arg0: i32) -> (i32, i32) {
    %c0_i32 = arith.constant 0 : i32
    %c0_i32_0 = arith.constant 0 : i32
    %c0_i32_1 = arith.constant 0 : i32
    return %c0_i32, %c0_i32_0 : i32, i32
  }
  func.func @transform_3(%arg0: i32) -> (i32, i32) {
    %c0_i32 = arith.constant 0 : i32
    %c0_i32_0 = arith.constant 0 : i32
    return %arg0, %c0_i32 : i32, i32
  }
}

</mosaic_0001>

<bundles_post_ra>
// kernel: tpu_custom_call.1
= control target key start
LH: loop header
LB: loop body
LE: loop exit
PB: predicated region body
PF: predicated region fallthrough
CT: control target
= control target key end

     0   :  { %8 = vsyncpa [#allocation3], 0  ;;  %s372_s0 = inlined_call_operand.hbm [shape: f32[32,32], index: 0, kind: input, shape index: {}]   ;;  %s373_s1 = inlined_call_operand.hbm [shape: f32[32,64], index: 1, kind: input, shape index: {}]   ;;  %s374_s2 = inlined_call_operand.vmem [shape: f32[1,64], index: 2, kind: input, shape index: {}]   ;;  %s375_s3 = inlined_call_operand.hbm [shape: f32[32,64], index: 3, kind: output, shape index: {}]  }
   0x1   :  { %9 = vsyncpa [#allocation6], 0 }
   0x2   :  { %10 = vsyncpa [#allocation4], 0  ;;  %s295_s12 = smov [#allocation2]   ;;  %s223_s16 = scalar_lea.hbm %s372_s0, 512 }
   0x3   :  { %s16_s13 = sshll.u32 %s295_s12, 4  ;;  %p224_p0 = scmp.ne.s32.totalorder %s372_s0, %s223_s16  ;;  %s17_s13 = int_to_ptr.vmem [resolvable:$true] %s16_s13 }
   0x4   :  { %p227_p1 = scmp.lt.u32.totalorder %s223_s16, %s372_s0 }
   0x6   :  { %p229_p2 = pnand %p227_p1, %p224_p0 }
   0x8   :  { %232 = shalt.err (!%p229_p2)
}
   0x9   :  { %s233_s21 = scalar_lea.vmem %s17_s13, 512  ;;  %p238_p4 = scmp.lt.s32.totalorder %s17_s13, %s17_s13 }
   0xa   :  { %p234_p3 = scmp.ne.s32.totalorder %s17_s13, %s233_s21  ;;  %p239_p5 = scmp.lt.s32.totalorder %s233_s21, %s233_s21 }
   0xc   :  { %p240_p6 = por %p239_p5, %p238_p4 }
   0xe   :  { %p241_p7 = pnand %p240_p6, %p234_p3 }
  0x10   :  { %244 = shalt.err (!%p241_p7)
}
  0x11   :  { %s296_s22 = smov 128   ;;  %s297_s23 = smov 8  }
  0x12   :  { %22 = dma.hbm_to_vmem [thread:$0]  %s372_s0, 512, %s17_s13, [#allocation3], %s296_s22, %s296_s22, %s297_s23  }
  0x13   :  { %s298_s26 = smov [#allocation5]   ;;  %s245_s30 = scalar_lea.hbm %s373_s1, 512 }
  0x14   :  { %s28_s27 = sshll.u32 %s298_s26, 4  ;;  %p246_p8 = scmp.ne.s32.totalorder %s373_s1, %s245_s30  ;;  %s29_s27 = int_to_ptr.vmem [resolvable:$true] %s28_s27 }
  0x15   :  { %p249_p9 = scmp.lt.u32.totalorder %s245_s30, %s373_s1 }
  0x17   :  { %p251_p10 = pnand %p249_p9, %p246_p8 }
  0x19   :  { %254 = shalt.err (!%p251_p10)
}
  0x1a   :  { %s255_s8 = scalar_lea.vmem %s29_s27, 512  ;;  %p260_p12 = scmp.lt.s32.totalorder %s29_s27, %s29_s27 }
  0x1b   :  { %p256_p11 = scmp.ne.s32.totalorder %s29_s27, %s255_s8  ;;  %p261_p13 = scmp.lt.s32.totalorder %s255_s8, %s255_s8 }
  0x1d   :  { %p262_p0 = por %p261_p13, %p260_p12 }
  0x1f   :  { %p263_p1 = pnand %p262_p0, %p256_p11 }
  0x21   :  { %266 = shalt.err (!%p263_p1)
}
  0x22   :  { %34 = dma.hbm_to_vmem [thread:$0]  %s373_s1, 512, %s29_s27, [#allocation6], %s296_s22, %s296_s22, %s297_s23  }
  0x23   :  { %289 = dma.done.wait [#allocation3], 512  }
  0x24   :  { %290 = vsyncadd [#allocation3], 4294966784 }
  0x25   :  { %291 = dma.done.wait [#allocation6], 512  }
  0x26   :  { %292 = vsyncadd [#allocation6], 4294966784  ;;  %vm58_vm0 = vcmask 261120   ;;  %v47_v0 = vld [vmem:[#allocation5] sm:$0xff]  ;;  %v48_v1 = vld [vmem:[#allocation5 + $0x8] sm:$0xff]  ;;  %s299_s11 = smov [#allocation7]  }
  0x27   :  { %v49_v2 = vld [vmem:[#allocation5 + $0x10] sm:$0xff]  ;;  %v206_v3 = vpack.c.bf16 %v48_v1, %v47_v0  ;;  %v50_v4 = vld [vmem:[#allocation5 + $0x18] sm:$0xff]  ;;  %v43_v5 = vld [vmem:[#allocation2] sm:$0xff]  ;;  %s166_s12 = sshll.u32 %s299_s11, 4  ;;  %vm156_vm1 = vcmask 523264   ;;  %s167_s12 = int_to_ptr.vmem [resolvable:$true] %s166_s12 }
  0x28   :  { %v45_v6 = vld [vmem:[#allocation2 + $0x10] sm:$0xff]  ;;  %v210_v7 = vpack.c.bf16 %v50_v4, %v49_v2  ;;  %200 = vmatprep.mubr.msk.f32.mxu0 %vm58_vm0, %v43_v5  ;;  %v44_v8 = vld [vmem:[#allocation2 + $0x8] sm:$0xff]  ;;  %v46_v9 = vld [vmem:[#allocation2 + $0x18] sm:$0xff]  ;;  %s267_s13 = scalar_lea.vmem %s167_s12, 512  ;;  %p272_p3 = scmp.lt.s32.totalorder %s167_s12, %s167_s12 }
  0x29   :  { %203 = vmatprep.mubr.msk.f32.mxu1 %vm58_vm0, %v45_v6  ;;  %207 = vmatprep.subr.bf16.mxu0 %v206_v3  ;;  %v179_v10 = vld [vmem:[%s374_s2] ss:$0 sm:$0xff]  ;;  %p268_p2 = scmp.ne.s32.totalorder %s167_s12, %s267_s13  ;;  %p273_p4 = scmp.lt.s32.totalorder %s267_s13, %s267_s13 }
  0x2a   :  { %214 = vmatprep.subr.bf16.mxu1 %v206_v3  ;;  %209 = vmatpush3.bf16.msra.mxu0 %v206_v3 }
  0x2b   :  { %216 = vmatpush3.bf16.msra.mxu1 %v206_v3  ;;  %211 = vmatprep.subr.bf16.mxu0 %v210_v7  ;;  %p274_p5 = por %p273_p4, %p272_p3 }
  0x2c   :  { %215 = vmatprep.subr.bf16.mxu1 %v210_v7 }
  0x2d   :  { %p275_p6 = pnand %p274_p5, %p268_p2 }
  0x2e   :  { %213 = vmatpush3.bf16.msra.mxu0 %v210_v7 }
  0x2f   :  { %217 = vmatpush3.bf16.msra.mxu1 %v210_v7 }
  0x31   :  { %201 = vmatmul.mubr.msk.f32.vlgmr.msra.gmra.mrb[0].mxu0 %vm58_vm0, %v44_v8 }
  0x32   :  { %204 = vmatmul.mubr.msk.f32.vlgmr.msra.gmra.mrb[0].mxu1 %vm58_vm0, %v46_v9 }
 0x104   :  { %v202_v11 = vpop.f32.mrb[0].mxu0 }
 0x105   :  { %v205_v12 = vpop.f32.mrb[0].mxu1  ;;  %v143_v13 = vadd.f32 %v202_v11, %v179_v10  ;;  %v137_v15 = vpop.f32.mrb[1].mxu0 }
 0x106   :  { %v153_v14 = vadd.f32 %v205_v12, %v179_v10  ;;  %v147_v16 = vpop.f32.mrb[1].mxu1  ;;  %v138_v17 = vadd.f32 %v179_v10, %v137_v15 }
 0x107   :  { %v148_v18 = vadd.f32 %v179_v10, %v147_v16  ;;  %158 = vst.msk [vmem:[#allocation7 + $0x8] sm:$0xff] %vm156_vm1, %v143_v13 }
 0x108   :  { %160 = vst.msk [vmem:[#allocation7 + $0x18] sm:$0xff] %vm156_vm1, %v153_v14  ;;  %157 = vst.msk [vmem:[#allocation7] sm:$0xff] %vm156_vm1, %v138_v17 }
 0x109   :  { %159 = vst.msk [vmem:[#allocation7 + $0x10] sm:$0xff] %vm156_vm1, %v148_v18 }
 0x10a   :  { %278 = shalt.err (!%p275_p6)
}
 0x10b   :  { %s279_s15 = scalar_lea.hbm %s375_s3, 512 }
 0x10c   :  { %p280_p7 = scmp.ne.s32.totalorder %s375_s3, %s279_s15  ;;  %p283_p8 = scmp.lt.u32.totalorder %s279_s15, %s375_s3 }
 0x10e   :  { %p285_p9 = pnand %p283_p8, %p280_p7 }
 0x110   :  { %288 = shalt.err (!%p285_p9)
}
 0x111   :  { %172 = dma.vmem_to_hbm [thread:$0]  %s167_s12, 512, %s375_s3, [#allocation4], %s296_s22, %s296_s22, %s297_s23  }
 0x112   :  { %293 = dma.done.wait [#allocation4], 512  }
 0x113   :  { %294 = vsyncadd [#allocation4], 4294966784 }
 0x114   :  { %176 = vsyncpa [#allocation3], 1 }
 0x115   :  { %177 = vsyncpa [#allocation6], 1 }
 0x116   :  { %178 = vsyncpa [#allocation4], 1 }

</bundles_post_ra>
